<compile_context>
chip_gen: v6e
topology: v6e:2x2x1
jax: 0.10.0
libtpu: 0.0.40
codegen_flags: <defaults>
</compile_context>

<pallas_src>
import numpy as np
import jax
import jax.numpy as jnp
from jax.experimental import pallas as pl
from jax.experimental.pallas import tpu as pltpu


def _decode_matmul_kernel(xg_ref, wg_ref, out_ref):
    # xg_ref: (B*3, Kp)  resident augmented activations (x_v rows + pos_ca rows)
    # wg_ref: (Kp, TN)   streamed weight tile (augmented block matrix, transposed)
    # out_ref:(B*3, TN)  lane-dense output tile
    out_ref[...] = jnp.dot(
        xg_ref[...], wg_ref[...], preferred_element_type=jnp.float32
    ).astype(out_ref.dtype)


def build_decode_weight(seq, letter_w, vdim):
    """Assemble the augmented block weight Wg (atoms_total, R*(vdim+1)).

    letter_w[L] has shape (natom_L, vdim) (the VecLinear(vdim, natom_L) weight).
    Done once per (static) sequence; not part of the per-call hot path.
    """
    natoms = [int(letter_w[L].shape[0]) for L in seq]
    starts = np.concatenate(([0], np.cumsum(natoms[:-1]))).astype(np.int64)
    atoms_total = int(np.sum(natoms))
    R = len(seq)
    K = R * (vdim + 1)
    wg = np.zeros((atoms_total, K), np.float32)
    for i, L in enumerate(seq):
        s, na = int(starts[i]), natoms[i]
        col = i * (vdim + 1)
        wg[s:s + na, col:col + vdim] = np.asarray(letter_w[L], np.float32)
        wg[s:s + na, col + vdim] = 1.0          # folds "+ pos_ca" into the GEMM
    return jnp.asarray(wg), atoms_total


def _pick_tile(atoms_pad, kp, vmem_budget_bytes=8 << 20):
    """Largest lane-tile (multiple of 128, dividing atoms_pad) whose
    double-buffered f32 weight slab fits within a conservative VMEM budget."""
    for tn in (2048, 1024, 512, 256, 128):
        if atoms_pad % tn == 0 and 2 * kp * tn * 4 <= vmem_budget_bytes:
            return tn
    return 128


def residues_decode(pos_ca, x_v, wg_aug, atoms_total):
    """pos_ca: (B, R, 3) f32; x_v: (B, R, vdim, 3) f32;
    wg_aug: (atoms_total, R*(vdim+1)) f32 from build_decode_weight.
    Returns x: (B, atoms_total, 3) f32."""
    B, R, vdim, _ = x_v.shape
    b3 = B * 3
    K = R * (vdim + 1)
    assert wg_aug.shape == (atoms_total, K)

    # --- static padding arithmetic (Python ints) ---
    Kp = ((K + 7) // 8) * 8                       # sublane-align the contraction
    atoms_pad = pl.cdiv(atoms_total, 128) * 128   # lane-align the atom axis
    tn = _pick_tile(atoms_pad, Kp)

    # Augmented activations: append pos_ca as the (vdim+1)-th "vector channel".
    xg = jnp.concatenate([x_v, pos_ca[:, :, None, :]], axis=2)   # (B, R, vdim+1, 3)
    # (B, R, vdim+1, 3) -> (B, 3, R, vdim+1) -> (B*3, K); row c = b*3 + d.
    xg_t = jnp.transpose(xg, (0, 3, 1, 2)).reshape(b3, K)
    if Kp > K:
        xg_t = jnp.pad(xg_t, ((0, 0), (0, Kp - K)))

    wg_t = wg_aug.T                                              # (K, atoms_total)
    if Kp > K or atoms_pad > atoms_total:
        wg_t = jnp.pad(wg_t, ((0, Kp - K), (0, atoms_pad - atoms_total)))

    grid = (atoms_pad // tn,)
    cost = pl.CostEstimate(
        flops=2 * b3 * Kp * atoms_pad,
        transcendentals=0,
        bytes_accessed=4 * (b3 * Kp + Kp * atoms_pad + b3 * atoms_pad),
    )

    out_t = pl.pallas_call(
        _decode_matmul_kernel,
        out_shape=jax.ShapeDtypeStruct((b3, atoms_pad), jnp.float32),
        grid_spec=pltpu.PrefetchScalarGridSpec(
            num_scalar_prefetch=0,
            grid=grid,
            in_specs=[
                pl.BlockSpec((b3, Kp), lambda j: (0, 0)),   # Xg^T resident across grid
                pl.BlockSpec((Kp, tn), lambda j: (0, j)),   # streamed weight tile
            ],
            out_specs=pl.BlockSpec((b3, tn), lambda j: (0, j)),
        ),
        compiler_params=pltpu.CompilerParams(
            dimension_semantics=("parallel",)),             # disjoint output tiles
        cost_estimate=cost,
    )(xg_t, wg_t)

    # (B*3, atoms) -> (B, 3, atoms) -> (B, atoms, 3)
    out = out_t[:, :atoms_total].reshape(B, 3, atoms_total)
    return jnp.transpose(out, (0, 2, 1))


if __name__ == "__main__":
    # synthetic "residue structures": decoded atoms per residue letter
    LETTER_NATOM = {"A": 5, "G": 4, "V": 7}
    SEQ = "AGVAGVAGVAGV"                          # metadata.seq (12 residues, 64 atoms)
    VDIM = 8
    B = 2

    natoms = [LETTER_NATOM[L] for L in SEQ]
    R = len(SEQ)

    # deterministic parameter / input init
    key = jax.random.PRNGKey(0)
    kpos, kxv, *kws = jax.random.split(key, 2 + len(LETTER_NATOM))
    letter_w = {
        L: 0.2 * jax.random.normal(kw, (LETTER_NATOM[L], VDIM), jnp.float32)
        for L, kw in zip(sorted(LETTER_NATOM), kws)
    }

    pos_ca = jax.random.normal(kpos, (B, R, 3), jnp.float32)
    x_v = jax.random.normal(kxv, (B, R, VDIM, 3), jnp.float32)

    wg_aug, atoms_total = build_decode_weight(SEQ, letter_w, VDIM)

    out = jax.block_until_ready(
        jax.jit(residues_decode, static_argnums=(3,))(pos_ca, x_v, wg_aug, atoms_total)
    )

    # pure numpy reference (PyTorch forward semantics)
    posn, xvn = np.asarray(pos_ca), np.asarray(x_v)
    chunks = []
    for i, L in enumerate(SEQ):
        W = np.asarray(letter_w[L])                              # (natom_L, vdim)
        dec = np.einsum("av,bvd->bad", W, xvn[:, i])             # VecLinear
        chunks.append(dec + posn[:, i, None, :])                 # + pos_ca broadcast
    out_ref = np.concatenate(chunks, axis=1)                     # (B, atoms, 3)

    np.testing.assert_allclose(np.asarray(out), out_ref, rtol=1e-4, atol=1e-5)
    print("KERNEL_OK")
</pallas_src>

<mosaic_0001>
module attributes {stable_mosaic.version = 11 : i64} {
  func.func @_decode_matmul_kernel(%arg0: i32, %arg1: memref<6x112xf32, #tpu.memory_space<vmem>>, %arg2: memref<112x128xf32, #tpu.memory_space<vmem>>, %arg3: memref<6x128xf32, #tpu.memory_space<vmem>>) attributes {dimension_semantics = [#tpu.dimension_semantics<parallel>], iteration_bounds = array<i64: 1>, scalar_prefetch = 0 : i64, scratch_operands = 0 : i64, tpu.core_type = #tpu.core_type<tc>, window_params = [{pipeline_mode = #tpu.pipeline_mode<synchronous>, transform_indices = @transform_0, window_bounds = array<i64: 6, 112>}, {transform_indices = @transform_1, window_bounds = array<i64: 112, 128>}, {transform_indices = @transform_2, window_bounds = array<i64: 6, 128>}]} {
    %c0 = arith.constant 0 : index
    %c0_0 = arith.constant 0 : index
    %0 = vector.load %arg1[%c0, %c0_0] : memref<6x112xf32, #tpu.memory_space<vmem>>, vector<6x112xf32>
    %c0_1 = arith.constant 0 : index
    %c0_2 = arith.constant 0 : index
    %1 = vector.load %arg2[%c0_1, %c0_2] : memref<112x128xf32, #tpu.memory_space<vmem>>, vector<112x128xf32>
    %cst = arith.constant dense<0.000000e+00> : vector<6x128xf32>
    %2 = tpu.matmul %0, %1, %cst {dimension_numbers = #tpu.dot_dimension_numbers<[1], [0], [0], [1], [0, 0, 1, 1], [], []>} : vector<6x112xf32>, vector<112x128xf32>, vector<6x128xf32> -> vector<6x128xf32>
    %c0_3 = arith.constant 0 : index
    %c0_4 = arith.constant 0 : index
    %3 = vector.load %arg3[%c0_3, %c0_4] : memref<6x128xf32, #tpu.memory_space<vmem>>, vector<6x128xf32>
    tpu.vector_store %arg3[%c0_3, %c0_4], %2 {strides = array<i32>} : memref<6x128xf32, #tpu.memory_space<vmem>>, vector<6x128xf32>,
    return
  }
  func.func @transform_0(%arg0: i32) -> (i32, i32) {
    %c0_i32 = arith.constant 0 : i32
    %c0_i32_0 = arith.constant 0 : i32
    %c0_i32_1 = arith.constant 0 : i32
    return %c0_i32, %c0_i32_0 : i32, i32
  }
  func.func @transform_1(%arg0: i32) -> (i32, i32) {
    %c0_i32 = arith.constant 0 : i32
    %c0_i32_0 = arith.constant 0 : i32
    return %c0_i32, %arg0 : i32, i32
  }
  func.func @transform_2(%arg0: i32) -> (i32, i32) {
    %c0_i32 = arith.constant 0 : i32
    %c0_i32_0 = arith.constant 0 : i32
    return %c0_i32, %arg0 : i32, i32
  }
}

</mosaic_0001>

<bundles_post_ra>
// kernel: residues_decode.1
= control target key start
LH: loop header
LB: loop body
LE: loop exit
PB: predicated region body
PF: predicated region fallthrough
CT: control target
= control target key end

     0   :  { %v154_v0 = vmov 0.0   ;;  %vm155_vm0 = vmmov 0   ;;  %vm26_vm1 = vcmask 916480   ;;  %s219_s1 = inlined_call_operand.vmem [shape: f32[112,128], index: 1, kind: input, shape index: {}]   ;;  %s220_s0 = inlined_call_operand.vmem [shape: f32[6,112], index: 0, kind: input, shape index: {}]   ;;  %s221_s2 = inlined_call_operand.vmem [shape: f32[6,128], index: 2, kind: output, shape index: {}]  }
   0x1   :  { %121 = vmatprep.subr.mxu0 %v154_v0  ;;  %v25_v1 = vld [vmem:[%s219_s1 + $0x68] sm:$0xff]  ;;  %v24_v2 = vld [vmem:[%s219_s1 + $0x60] sm:$0xff]  ;;  %149 = vmatprep.mubr.msk.f32.mxu0 %vm155_vm0, %v154_v0  ;;  %v23_v3 = vld [vmem:[%s219_s1 + $0x58] sm:$0xff] }
   0x2   :  { %122 = vmatpush3.msra.mxu0 %v25_v1  ;;  %v22_v4 = vld [vmem:[%s219_s1 + $0x50] sm:$0xff]  ;;  %v21_v5 = vld [vmem:[%s219_s1 + $0x48] sm:$0xff]  ;;  %v20_v6 = vld [vmem:[%s219_s1 + $0x40] sm:$0xff] }
   0x3   :  { %123 = vmatprep.subr.mxu0 %v154_v0  ;;  %v19_v7 = vld [vmem:[%s219_s1 + $0x38] sm:$0xff]  ;;  %v18_v8 = vld [vmem:[%s219_s1 + $0x30] sm:$0xff]  ;;  %v17_v9 = vld [vmem:[%s219_s1 + $0x28] sm:$0xff] }
   0x4   :  { %124 = vmatpush3.msra.mxu0 %v24_v2  ;;  %v16_v10 = vld [vmem:[%s219_s1 + $0x20] sm:$0xff]  ;;  %v15_v11 = vld [vmem:[%s219_s1 + $0x18] sm:$0xff]  ;;  %v14_v12 = vld [vmem:[%s219_s1 + $0x10] sm:$0xff] }
   0x5   :  { %125 = vmatprep.subr.mxu0 %v154_v0  ;;  %v13_v13 = vld [vmem:[%s219_s1 + $0x8] sm:$0xff]  ;;  %v12_v14 = vld [vmem:[%s219_s1] sm:$0xff] }
   0x6   :  { %126 = vmatpush3.msra.mxu0 %v23_v3  ;;  %v11_v15 = vld [vmem:[%s220_s0] sm:$0x3f] }
   0x7   :  { %127 = vmatprep.subr.mxu0 %v154_v0 }
   0x8   :  { %128 = vmatpush3.msra.mxu0 %v22_v4 }
   0x9   :  { %129 = vmatprep.subr.mxu0 %v154_v0 }
   0xa   :  { %130 = vmatpush3.msra.mxu0 %v21_v5 }
   0xb   :  { %131 = vmatprep.subr.mxu0 %v154_v0 }
   0xc   :  { %132 = vmatpush3.msra.mxu0 %v20_v6 }
   0xd   :  { %133 = vmatprep.subr.mxu0 %v154_v0 }
   0xe   :  { %134 = vmatpush3.msra.mxu0 %v19_v7 }
   0xf   :  { %135 = vmatprep.subr.mxu0 %v154_v0 }
  0x10   :  { %136 = vmatpush3.msra.mxu0 %v18_v8 }
  0x11   :  { %137 = vmatprep.subr.mxu0 %v154_v0 }
  0x12   :  { %138 = vmatpush3.msra.mxu0 %v17_v9 }
  0x13   :  { %139 = vmatprep.subr.mxu0 %v154_v0 }
  0x14   :  { %140 = vmatpush3.msra.mxu0 %v16_v10 }
  0x15   :  { %141 = vmatprep.subr.mxu0 %v154_v0 }
  0x16   :  { %142 = vmatpush3.msra.mxu0 %v15_v11 }
  0x17   :  { %143 = vmatprep.subr.mxu0 %v154_v0 }
  0x18   :  { %144 = vmatpush3.msra.mxu0 %v14_v12 }
  0x19   :  { %145 = vmatprep.subr.mxu0 %v154_v0 }
  0x1a   :  { %146 = vmatpush3.msra.mxu0 %v13_v13 }
  0x1b   :  { %147 = vmatprep.subr.mxu0 %v154_v0 }
  0x1c   :  { %148 = vmatpush3.msra.mxu0 %v12_v14 }
  0x1d   :  { %150 = vmatmul.mubr.msk.f32.vlgmr.msra.gmra.mxu0 %vm26_vm1, %v11_v15 }
  0xdd   :  { %v96_v16 = vpop.f32.mrf.mxu0 }
  0xde   :  { %100 = vst [vmem:[%s221_s2] sm:$0x3f] %v96_v16 }
  0xdf   :  { %v151_v17 = vpop.f32.mrf.mxu0 }

</bundles_post_ra>
